<compile_context>
chip_gen: v5e
topology: v5e:2x2
jax: 0.10.0
libtpu: 0.0.40
codegen_flags: <defaults>
</compile_context>

<pallas_src>
import jax
import jax.numpy as jnp
from jax.experimental import pallas as pl
from jax.experimental.pallas import tpu as pltpu

BN_EPS = 1e-5


# ------------------------------------------------------------------ helpers
def _round_up(x, m):
    return ((x + m - 1) // m) * m


def _pad2(a, rows, cols):
    r, c = a.shape
    if r == rows and c == cols:
        return a
    return jnp.pad(a, ((0, rows - r), (0, cols - c)))


# ------------------------------------------------------------------ kernels
def _make_fused_kernel(relu: bool, res_mode: str):
    """conv-as-matmul (K-tiled, f32 acc) + BN bias [+ residual | + fused 1x1
    shortcut conv] [+ ReLU] with the epilogue run on the last K step."""

    def body(p_ref, w_ref, b_ref, o_ref, acc_ref,
             r_ref=None, xs_ref=None, ws_ref=None, bs_ref=None):
        @pl.when(pl.program_id(2) == 0)
        def _init():
            acc_ref[...] = jnp.zeros_like(acc_ref)

        # bf16 x bf16 -> f32 accumulate on the MXU
        acc_ref[...] += jnp.dot(p_ref[...], w_ref[...],
                                preferred_element_type=jnp.float32)

        @pl.when(pl.program_id(2) == pl.num_programs(2) - 1)
        def _epilogue():
            y = acc_ref[...] + b_ref[...]           # BN scale folded into weights
            if res_mode == "add":                    # identity residual
                y = y + r_ref[...].astype(jnp.float32)
            elif res_mode == "conv":                 # fused 1x1 shortcut conv + BN
                y = y + jnp.dot(xs_ref[...], ws_ref[...],
                                preferred_element_type=jnp.float32) + bs_ref[...]
            if relu:
                y = jnp.maximum(y, 0.0)
            o_ref[...] = y.astype(o_ref.dtype)

    if res_mode == "none":
        def kernel(p_ref, w_ref, b_ref, o_ref, acc_ref):
            body(p_ref, w_ref, b_ref, o_ref, acc_ref)
    elif res_mode == "add":
        def kernel(p_ref, w_ref, b_ref, r_ref, o_ref, acc_ref):
            body(p_ref, w_ref, b_ref, o_ref, acc_ref, r_ref=r_ref)
    elif res_mode == "conv":
        def kernel(p_ref, w_ref, b_ref, xs_ref, ws_ref, bs_ref, o_ref, acc_ref):
            body(p_ref, w_ref, b_ref, o_ref, acc_ref,
                 xs_ref=xs_ref, ws_ref=ws_ref, bs_ref=bs_ref)
    else:
        raise ValueError(res_mode)
    return kernel


def fused_conv_matmul(patches, w2d, bias, *, residual=None, shortcut=None,
                      relu=False, out_dtype=jnp.bfloat16,
                      tm=256, tn=128, tk=512):
    """patches: (M, K); w2d: (K, Cout) with BN scale folded in; bias: (Cout,).
    residual: optional (M, Cout) slab added in the epilogue.
    shortcut: optional (xs (M, Ck), ws (Ck, Cout), bs (Cout,)) -> fused 1x1 conv+BN.
    Returns (M, Cout) in out_dtype."""
    M, K = patches.shape
    Cout = w2d.shape[1]

    TM = min(tm, _round_up(M, 8))
    TN = min(tn, _round_up(Cout, 128))
    TK = min(tk, _round_up(K, 128))
    Mp, Kp, Np = _round_up(M, TM), _round_up(K, TK), _round_up(Cout, TN)

    p = _pad2(patches, Mp, Kp).astype(jnp.bfloat16)
    w = _pad2(w2d, Kp, Np).astype(jnp.bfloat16)
    b = _pad2(bias.reshape(1, Cout).astype(jnp.float32), 1, Np)

    args = [p, w, b]
    in_specs = [
        pl.BlockSpec((TM, TK), lambda i, j, k: (i, k)),
        pl.BlockSpec((TK, TN), lambda i, j, k: (k, j)),
        pl.BlockSpec((1, TN), lambda i, j, k: (0, j)),
    ]

    res_mode = "none"
    if residual is not None:
        res_mode = "add"
        args.append(_pad2(residual, Mp, Np).astype(jnp.bfloat16))
        in_specs.append(pl.BlockSpec((TM, TN), lambda i, j, k: (i, j)))
    elif shortcut is not None:
        res_mode = "conv"
        xs, ws, bs = shortcut
        Ck = xs.shape[1]
        Ckp = _round_up(Ck, 128)
        args += [
            _pad2(xs, Mp, Ckp).astype(jnp.bfloat16),
            _pad2(ws, Ckp, Np).astype(jnp.bfloat16),
            _pad2(bs.reshape(1, Cout).astype(jnp.float32), 1, Np),
        ]
        in_specs += [
            pl.BlockSpec((TM, Ckp), lambda i, j, k: (i, 0)),
            pl.BlockSpec((Ckp, TN), lambda i, j, k: (0, j)),
            pl.BlockSpec((1, TN), lambda i, j, k: (0, j)),
        ]

    kernel = _make_fused_kernel(relu, res_mode)
    grid = (Mp // TM, Np // TN, Kp // TK)

    flops = 2 * Mp * Kp * Np
    bytes_accessed = int(p.size) * 2 + int(w.size) * 2 + \
        Mp * Np * jnp.dtype(out_dtype).itemsize

    out = pl.pallas_call(
        kernel,
        out_shape=jax.ShapeDtypeStruct((Mp, Np), out_dtype),
        grid=grid,
        in_specs=in_specs,
        out_specs=pl.BlockSpec((TM, TN), lambda i, j, k: (i, j)),
        scratch_shapes=[pltpu.VMEM((TM, TN), jnp.float32)],
        compiler_params=pltpu.CompilerParams(
            dimension_semantics=("parallel", "parallel", "arbitrary"),
            vmem_limit_bytes=32 * 1024 * 1024),
        cost_estimate=pl.CostEstimate(flops=flops, transcendentals=0,
                                      bytes_accessed=bytes_accessed),
    )(*args)
    return out[:M, :Cout]


# ------------------------------------------------------------------ glue
def im2col(x, k, stride, pad):
    """x: (N, H, W, C) -> ((N*Ho*Wo, k*k*C), Ho, Wo); feature order (ky, kx, C)."""
    N, H, W, C = x.shape
    xp = jnp.pad(x, ((0, 0), (pad, pad), (pad, pad), (0, 0)))
    Ho = (H + 2 * pad - k) // stride + 1
    Wo = (W + 2 * pad - k) // stride + 1
    cols = []
    for dy in range(k):
        for dx in range(k):
            cols.append(xp[:, dy:dy + (Ho - 1) * stride + 1:stride,
                           dx:dx + (Wo - 1) * stride + 1:stride, :])
    patches = jnp.concatenate(cols, axis=-1)
    return patches.reshape(N * Ho * Wo, k * k * C), Ho, Wo


def init_conv_bn(key, cin, cout, ksize):
    k1, k2, k3, k4, k5 = jax.random.split(key, 5)
    w4 = jax.random.normal(k1, (ksize, ksize, cin, cout), jnp.float32) * 0.1
    gamma = jax.random.uniform(k2, (cout,), jnp.float32, 0.5, 1.5)
    beta = jax.random.normal(k3, (cout,), jnp.float32) * 0.1
    rmean = jax.random.normal(k4, (cout,), jnp.float32) * 0.1
    rvar = jax.random.uniform(k5, (cout,), jnp.float32, 0.5, 1.5)
    scale = gamma / jnp.sqrt(rvar + BN_EPS)
    bias = beta - rmean * scale
    # fold BN scale into the matmul weight (inference-mode BN)
    w2d = w4.reshape(ksize * ksize * cin, cout) * scale[None, :]
    return dict(w4=w4, w2d=w2d, scale=scale, bias=bias)


def init_res_block(key, cin, cout):
    k1, k2, k3 = jax.random.split(key, 3)
    prm = dict(conv1=init_conv_bn(k1, cin, cout, 3),
               conv2=init_conv_bn(k2, cout, cout, 3))
    if cin != cout:
        prm["short"] = init_conv_bn(k3, cin, cout, 1)
    return prm


def init_resnet_layer(key, cin, cout, num_blocks):
    keys = jax.random.split(key, num_blocks)
    blocks = [init_res_block(keys[0], cin, cout)]
    for b in range(1, num_blocks):
        blocks.append(init_res_block(keys[b], cout, cout))
    return blocks


def res_block_forward(x_nhwc, prm):
    """One ResBlock, x_nhwc: (N, H, W, Cin) bf16 -> (N, Ho, Wo, Cout) bf16."""
    N, H, W, cin = x_nhwc.shape
    cout = prm["conv1"]["w2d"].shape[1]
    stride = 2 if cin != cout else 1

    # main path: conv3x3(stride) + BN + ReLU
    p1, Ho, Wo = im2col(x_nhwc, 3, stride, 1)
    h = fused_conv_matmul(p1, prm["conv1"]["w2d"], prm["conv1"]["bias"],
                          relu=True, out_dtype=jnp.bfloat16)
    h = h.reshape(N, Ho, Wo, cout)

    # conv3x3(stride 1) + BN + residual + ReLU fused in one kernel
    p2, Ho2, Wo2 = im2col(h, 3, 1, 1)
    if cin != cout:
        # fused 1x1 stride-2 shortcut conv + BN inside the conv2 epilogue
        xs = x_nhwc[:, ::2, ::2, :].reshape(N * Ho2 * Wo2, cin)
        out = fused_conv_matmul(
            p2, prm["conv2"]["w2d"], prm["conv2"]["bias"],
            shortcut=(xs, prm["short"]["w2d"], prm["short"]["bias"]),
            relu=True, out_dtype=jnp.bfloat16)
    else:
        residual = x_nhwc.reshape(N * H * W, cout)
        out = fused_conv_matmul(
            p2, prm["conv2"]["w2d"], prm["conv2"]["bias"],
            residual=residual, relu=True, out_dtype=jnp.bfloat16)
    return out.reshape(N, Ho2, Wo2, cout)


@jax.jit
def resnet_layer_forward(x_nchw, params):
    x = jnp.transpose(x_nchw, (0, 2, 3, 1)).astype(jnp.bfloat16)  # NCHW -> NHWC
    for prm in params:
        x = res_block_forward(x, prm)
    return jnp.transpose(x, (0, 3, 1, 2)).astype(jnp.float32)     # NHWC -> NCHW


# ------------------------------------------------------------------ reference
def _conv_bn_ref(x, p, stride, pad):
    y = jax.lax.conv_general_dilated(
        x, p["w4"], (stride, stride), [(pad, pad), (pad, pad)],
        dimension_numbers=("NHWC", "HWIO", "NHWC"))
    return y * p["scale"] + p["bias"]


def resnet_layer_ref(x_nchw, params):
    x = jnp.transpose(x_nchw, (0, 2, 3, 1))
    for prm in params:
        cin = x.shape[-1]
        cout = prm["conv1"]["w2d"].shape[1]
        stride = 2 if cin != cout else 1
        residual = x if cin == cout else _conv_bn_ref(x, prm["short"], 2, 0)
        h = jax.nn.relu(_conv_bn_ref(x, prm["conv1"], stride, 1))
        h = _conv_bn_ref(h, prm["conv2"], 1, 1)
        x = jax.nn.relu(h + residual)
    return jnp.transpose(x, (0, 3, 1, 2))


# ------------------------------------------------------------------ main
if __name__ == "__main__":
    key = jax.random.PRNGKey(0)
    k_x, k_p = jax.random.split(key)

    N, Cin, H, W = 2, 4, 16, 16
    Cout, num_blocks = 8, 2

    x = jax.random.normal(k_x, (N, Cin, H, W), jnp.float32)  # NCHW like PyTorch
    params = init_resnet_layer(k_p, Cin, Cout, num_blocks)

    out = jax.block_until_ready(resnet_layer_forward(x, params))
    ref = jax.block_until_ready(resnet_layer_ref(x, params))

    assert out.shape == (N, Cout, H // 2, W // 2), out.shape
    # bf16 matmul operands + bf16 intermediate activations => relaxed tolerance
    # vs the f32 reference (accumulation and epilogue stay in f32).
    assert jnp.allclose(out, ref, atol=1e-1, rtol=5e-2), \
        float(jnp.max(jnp.abs(out - ref)))

    print("KERNEL_OK")
</pallas_src>

<mosaic_0001>
module attributes {stable_mosaic.version = 11 : i64} {
  func.func @kernel(%arg0: i32, %arg1: i32, %arg2: i32, %arg3: memref<128x128xbf16, #tpu.memory_space<vmem>>, %arg4: memref<128x128xbf16, #tpu.memory_space<vmem>>, %arg5: memref<1x128xf32, #tpu.memory_space<vmem>>, %arg6: memref<128x128xbf16, #tpu.memory_space<vmem>>, %arg7: memref<128x128xf32, #tpu.memory_space<vmem>>) attributes {dimension_semantics = [#tpu.dimension_semantics<parallel>, #tpu.dimension_semantics<parallel>, #tpu.dimension_semantics<arbitrary>], iteration_bounds = array<i64: 1, 1, 1>, scalar_prefetch = 0 : i64, scratch_operands = 1 : i64, tpu.core_type = #tpu.core_type<tc>, window_params = [{transform_indices = @transform_0, window_bounds = array<i64: 128, 128>}, {transform_indices = @transform_1, window_bounds = array<i64: 128, 128>}, {transform_indices = @transform_2, window_bounds = array<i64: 1, 128>}, {transform_indices = @transform_3, window_bounds = array<i64: 128, 128>}]} {
    %c0_i32 = arith.constant 0 : i32
    %0 = arith.cmpi eq, %arg2, %c0_i32 : i32
    %1 = arith.extui %0 : i1 to i32
    %c0_i32_0 = arith.constant 0 : i32
    %2 = arith.cmpi ne, %1, %c0_i32_0 : i32
    scf.if %2 {
      %cst_10 = arith.constant 0.000000e+00 : f32
      %12 = vector.broadcast %cst_10 : f32 to vector<128x128xf32>
      %c0_11 = arith.constant 0 : index
      %c0_12 = arith.constant 0 : index
      %13 = vector.load %arg7[%c0_11, %c0_12] : memref<128x128xf32, #tpu.memory_space<vmem>>, vector<128x128xf32>
      tpu.vector_store %arg7[%c0_11, %c0_12], %12 {strides = array<i32>} : memref<128x128xf32, #tpu.memory_space<vmem>>, vector<128x128xf32>,
    } else {
    }
    %c0 = arith.constant 0 : index
    %c0_1 = arith.constant 0 : index
    %3 = vector.load %arg7[%c0, %c0_1] : memref<128x128xf32, #tpu.memory_space<vmem>>, vector<128x128xf32>
    %c0_2 = arith.constant 0 : index
    %c0_3 = arith.constant 0 : index
    %4 = vector.load %arg3[%c0_2, %c0_3] : memref<128x128xbf16, #tpu.memory_space<vmem>>, vector<128x128xbf16>
    %c0_4 = arith.constant 0 : index
    %c0_5 = arith.constant 0 : index
    %5 = vector.load %arg4[%c0_4, %c0_5] : memref<128x128xbf16, #tpu.memory_space<vmem>>, vector<128x128xbf16>
    %cst = arith.constant dense<0.000000e+00> : vector<128x128xf32>
    %6 = tpu.matmul %4, %5, %cst {dimension_numbers = #tpu.dot_dimension_numbers<[1], [0], [0], [1], [0, 0, 1, 1], [], []>} : vector<128x128xbf16>, vector<128x128xbf16>, vector<128x128xf32> -> vector<128x128xf32>
    %7 = arith.addf %3, %6 : vector<128x128xf32>
    %c0_6 = arith.constant 0 : index
    %c0_7 = arith.constant 0 : index
    %8 = vector.load %arg7[%c0_6, %c0_7] : memref<128x128xf32, #tpu.memory_space<vmem>>, vector<128x128xf32>
    tpu.vector_store %arg7[%c0_6, %c0_7], %7 {strides = array<i32>} : memref<128x128xf32, #tpu.memory_space<vmem>>, vector<128x128xf32>,
    %c0_i32_8 = arith.constant 0 : i32
    %9 = arith.cmpi eq, %arg2, %c0_i32_8 : i32
    %10 = arith.extui %9 : i1 to i32
    %c0_i32_9 = arith.constant 0 : i32
    %11 = arith.cmpi ne, %10, %c0_i32_9 : i32
    scf.if %11 {
      %c0_10 = arith.constant 0 : index
      %c0_11 = arith.constant 0 : index
      %12 = vector.load %arg7[%c0_10, %c0_11] : memref<128x128xf32, #tpu.memory_space<vmem>>, vector<128x128xf32>
      %c0_12 = arith.constant 0 : index
      %c0_13 = arith.constant 0 : index
      %13 = vector.load %arg5[%c0_12, %c0_13] : memref<1x128xf32, #tpu.memory_space<vmem>>, vector<1x128xf32>
      %14 = vector.broadcast %13 : vector<1x128xf32> to vector<128x128xf32>
      %15 = arith.addf %12, %14 : vector<128x128xf32>
      %cst_14 = arith.constant 0.000000e+00 : f32
      %16 = vector.broadcast %cst_14 : f32 to vector<128x128xf32>
      %17 = arith.maximumf %15, %16 : vector<128x128xf32>
      %18 = arith.truncf %17 : vector<128x128xf32> to vector<128x128xbf16>
      %c0_15 = arith.constant 0 : index
      %c0_16 = arith.constant 0 : index
      %19 = vector.load %arg6[%c0_15, %c0_16] : memref<128x128xbf16, #tpu.memory_space<vmem>>, vector<128x128xbf16>
      tpu.vector_store %arg6[%c0_15, %c0_16], %18 {strides = array<i32>} : memref<128x128xbf16, #tpu.memory_space<vmem>>, vector<128x128xbf16>,
    } else {
    }
    return
  }
  func.func @transform_0(%arg0: i32, %arg1: i32, %arg2: i32) -> (i32, i32) {
    %c0_i32 = arith.constant 0 : i32
    return %arg0, %arg2 : i32, i32
  }
  func.func @transform_1(%arg0: i32, %arg1: i32, %arg2: i32) -> (i32, i32) {
    %c0_i32 = arith.constant 0 : i32
    return %arg2, %arg1 : i32, i32
  }
  func.func @transform_2(%arg0: i32, %arg1: i32, %arg2: i32) -> (i32, i32) {
    %c0_i32 = arith.constant 0 : i32
    %c0_i32_0 = arith.constant 0 : i32
    return %c0_i32, %arg1 : i32, i32
  }
  func.func @transform_3(%arg0: i32, %arg1: i32, %arg2: i32) -> (i32, i32) {
    %c0_i32 = arith.constant 0 : i32
    return %arg0, %arg1 : i32, i32
  }
}

module attributes {stable_mosaic.version = 11 : i64} {
  func.func @kernel(%arg0: i32, %arg1: i32, %arg2: i32, %arg3: memref<128x128xbf16, #tpu.memory_space<vmem>>, %arg4: memref<128x128xbf16, #tpu.memory_space<vmem>>, %arg5: memref<1x128xf32, #tpu.memory_space<vmem>>, %arg6: memref<128x128xbf16, #tpu.memory_space<vmem>>, %arg7: memref<128x128xbf16, #tpu.memory_space<vmem>>, %arg8: memref<1x128xf32, #tpu.memory_space<vmem>>, %arg9: memref<128x128xbf16, #tpu.memory_space<vmem>>, %arg10: memref<128x128xf32, #tpu.memory_space<vmem>>) attributes {dimension_semantics = [#tpu.dimension_semantics<parallel>, #tpu.dimension_semantics<parallel>, #tpu.dimension_semantics<arbitrary>], iteration_bounds = array<i64: 1, 1, 1>, scalar_prefetch = 0 : i64, scratch_operands = 1 : i64, tpu.core_type = #tpu.core_type<tc>, window_params = [{transform_indices = @transform_0, window_bounds = array<i64: 128, 128>}, {transform_indices = @transform_1, window_bounds = array<i64: 128, 128>}, {transform_indices = @transform_2, window_bounds = array<i64: 1, 128>}, {transform_indices = @transform_3, window_bounds = array<i64: 128, 128>}, {transform_indices = @transform_4, window_bounds = array<i64: 128, 128>}, {transform_indices = @transform_5, window_bounds = array<i64: 1, 128>}, {transform_indices = @transform_6, window_bounds = array<i64: 128, 128>}]} {
    %c0_i32 = arith.constant 0 : i32
    %0 = arith.cmpi eq, %arg2, %c0_i32 : i32
    %1 = arith.extui %0 : i1 to i32
    %c0_i32_0 = arith.constant 0 : i32
    %2 = arith.cmpi ne, %1, %c0_i32_0 : i32
    scf.if %2 {
      %cst_10 = arith.constant 0.000000e+00 : f32
      %12 = vector.broadcast %cst_10 : f32 to vector<128x128xf32>
      %c0_11 = arith.constant 0 : index
      %c0_12 = arith.constant 0 : index
      %13 = vector.load %arg10[%c0_11, %c0_12] : memref<128x128xf32, #tpu.memory_space<vmem>>, vector<128x128xf32>
      tpu.vector_store %arg10[%c0_11, %c0_12], %12 {strides = array<i32>} : memref<128x128xf32, #tpu.memory_space<vmem>>, vector<128x128xf32>,
    } else {
    }
    %c0 = arith.constant 0 : index
    %c0_1 = arith.constant 0 : index
    %3 = vector.load %arg10[%c0, %c0_1] : memref<128x128xf32, #tpu.memory_space<vmem>>, vector<128x128xf32>
    %c0_2 = arith.constant 0 : index
    %c0_3 = arith.constant 0 : index
    %4 = vector.load %arg3[%c0_2, %c0_3] : memref<128x128xbf16, #tpu.memory_space<vmem>>, vector<128x128xbf16>
    %c0_4 = arith.constant 0 : index
    %c0_5 = arith.constant 0 : index
    %5 = vector.load %arg4[%c0_4, %c0_5] : memref<128x128xbf16, #tpu.memory_space<vmem>>, vector<128x128xbf16>
    %cst = arith.constant dense<0.000000e+00> : vector<128x128xf32>
    %6 = tpu.matmul %4, %5, %cst {dimension_numbers = #tpu.dot_dimension_numbers<[1], [0], [0], [1], [0, 0, 1, 1], [], []>} : vector<128x128xbf16>, vector<128x128xbf16>, vector<128x128xf32> -> vector<128x128xf32>
    %7 = arith.addf %3, %6 : vector<128x128xf32>
    %c0_6 = arith.constant 0 : index
    %c0_7 = arith.constant 0 : index
    %8 = vector.load %arg10[%c0_6, %c0_7] : memref<128x128xf32, #tpu.memory_space<vmem>>, vector<128x128xf32>
    tpu.vector_store %arg10[%c0_6, %c0_7], %7 {strides = array<i32>} : memref<128x128xf32, #tpu.memory_space<vmem>>, vector<128x128xf32>,
    %c0_i32_8 = arith.constant 0 : i32
    %9 = arith.cmpi eq, %arg2, %c0_i32_8 : i32
    %10 = arith.extui %9 : i1 to i32
    %c0_i32_9 = arith.constant 0 : i32
    %11 = arith.cmpi ne, %10, %c0_i32_9 : i32
    scf.if %11 {
      %c0_10 = arith.constant 0 : index
      %c0_11 = arith.constant 0 : index
      %12 = vector.load %arg10[%c0_10, %c0_11] : memref<128x128xf32, #tpu.memory_space<vmem>>, vector<128x128xf32>
      %c0_12 = arith.constant 0 : index
      %c0_13 = arith.constant 0 : index
      %13 = vector.load %arg5[%c0_12, %c0_13] : memref<1x128xf32, #tpu.memory_space<vmem>>, vector<1x128xf32>
      %14 = vector.broadcast %13 : vector<1x128xf32> to vector<128x128xf32>
      %15 = arith.addf %12, %14 : vector<128x128xf32>
      %c0_14 = arith.constant 0 : index
      %c0_15 = arith.constant 0 : index
      %16 = vector.load %arg6[%c0_14, %c0_15] : memref<128x128xbf16, #tpu.memory_space<vmem>>, vector<128x128xbf16>
      %c0_16 = arith.constant 0 : index
      %c0_17 = arith.constant 0 : index
      %17 = vector.load %arg7[%c0_16, %c0_17] : memref<128x128xbf16, #tpu.memory_space<vmem>>, vector<128x128xbf16>
      %cst_18 = arith.constant dense<0.000000e+00> : vector<128x128xf32>
      %18 = tpu.matmul %16, %17, %cst_18 {dimension_numbers = #tpu.dot_dimension_numbers<[1], [0], [0], [1], [0, 0, 1, 1], [], []>} : vector<128x128xbf16>, vector<128x128xbf16>, vector<128x128xf32> -> vector<128x128xf32>
      %19 = arith.addf %15, %18 : vector<128x128xf32>
      %c0_19 = arith.constant 0 : index
      %c0_20 = arith.constant 0 : index
      %20 = vector.load %arg8[%c0_19, %c0_20] : memref<1x128xf32, #tpu.memory_space<vmem>>, vector<1x128xf32>
      %21 = vector.broadcast %20 : vector<1x128xf32> to vector<128x128xf32>
      %22 = arith.addf %19, %21 : vector<128x128xf32>
      %cst_21 = arith.constant 0.000000e+00 : f32
      %23 = vector.broadcast %cst_21 : f32 to vector<128x128xf32>
      %24 = arith.maximumf %22, %23 : vector<128x128xf32>
      %25 = arith.truncf %24 : vector<128x128xf32> to vector<128x128xbf16>
      %c0_22 = arith.constant 0 : index
      %c0_23 = arith.constant 0 : index
      %26 = vector.load %arg9[%c0_22, %c0_23] : memref<128x128xbf16, #tpu.memory_space<vmem>>, vector<128x128xbf16>
      tpu.vector_store %arg9[%c0_22, %c0_23], %25 {strides = array<i32>} : memref<128x128xbf16, #tpu.memory_space<vmem>>, vector<128x128xbf16>,
    } else {
    }
    return
  }
  func.func @transform_0(%arg0: i32, %arg1: i32, %arg2: i32) -> (i32, i32) {
    %c0_i32 = arith.constant 0 : i32
    return %arg0, %arg2 : i32, i32
  }
  func.func @transform_1(%arg0: i32, %arg1: i32, %arg2: i32) -> (i32, i32) {
    %c0_i32 = arith.constant 0 : i32
    return %arg2, %arg1 : i32, i32
  }
  func.func @transform_2(%arg0: i32, %arg1: i32, %arg2: i32) -> (i32, i32) {
    %c0_i32 = arith.constant 0 : i32
    %c0_i32_0 = arith.constant 0 : i32
    return %c0_i32, %arg1 : i32, i32
  }
  func.func @transform_3(%arg0: i32, %arg1: i32, %arg2: i32) -> (i32, i32) {
    %c0_i32 = arith.constant 0 : i32
    %c0_i32_0 = arith.constant 0 : i32
    return %arg0, %c0_i32 : i32, i32
  }
  func.func @transform_4(%arg0: i32, %arg1: i32, %arg2: i32) -> (i32, i32) {
    %c0_i32 = arith.constant 0 : i32
    %c0_i32_0 = arith.constant 0 : i32
    return %c0_i32, %arg1 : i32, i32
  }
  func.func @transform_5(%arg0: i32, %arg1: i32, %arg2: i32) -> (i32, i32) {
    %c0_i32 = arith.constant 0 : i32
    %c0_i32_0 = arith.constant 0 : i32
    return %c0_i32, %arg1 : i32, i32
  }
  func.func @transform_6(%arg0: i32, %arg1: i32, %arg2: i32) -> (i32, i32) {
    %c0_i32 = arith.constant 0 : i32
    return %arg0, %arg1 : i32, i32
  }
}

module attributes {stable_mosaic.version = 11 : i64} {
  func.func @kernel(%arg0: i32, %arg1: i32, %arg2: i32, %arg3: memref<128x128xbf16, #tpu.memory_space<vmem>>, %arg4: memref<128x128xbf16, #tpu.memory_space<vmem>>, %arg5: memref<1x128xf32, #tpu.memory_space<vmem>>, %arg6: memref<128x128xbf16, #tpu.memory_space<vmem>>, %arg7: memref<128x128xbf16, #tpu.memory_space<vmem>>, %arg8: memref<128x128xf32, #tpu.memory_space<vmem>>) attributes {dimension_semantics = [#tpu.dimension_semantics<parallel>, #tpu.dimension_semantics<parallel>, #tpu.dimension_semantics<arbitrary>], iteration_bounds = array<i64: 1, 1, 1>, scalar_prefetch = 0 : i64, scratch_operands = 1 : i64, tpu.core_type = #tpu.core_type<tc>, window_params = [{transform_indices = @transform_0, window_bounds = array<i64: 128, 128>}, {transform_indices = @transform_1, window_bounds = array<i64: 128, 128>}, {transform_indices = @transform_2, window_bounds = array<i64: 1, 128>}, {transform_indices = @transform_3, window_bounds = array<i64: 128, 128>}, {transform_indices = @transform_4, window_bounds = array<i64: 128, 128>}]} {
    %c0_i32 = arith.constant 0 : i32
    %0 = arith.cmpi eq, %arg2, %c0_i32 : i32
    %1 = arith.extui %0 : i1 to i32
    %c0_i32_0 = arith.constant 0 : i32
    %2 = arith.cmpi ne, %1, %c0_i32_0 : i32
    scf.if %2 {
      %cst_10 = arith.constant 0.000000e+00 : f32
      %12 = vector.broadcast %cst_10 : f32 to vector<128x128xf32>
      %c0_11 = arith.constant 0 : index
      %c0_12 = arith.constant 0 : index
      %13 = vector.load %arg8[%c0_11, %c0_12] : memref<128x128xf32, #tpu.memory_space<vmem>>, vector<128x128xf32>
      tpu.vector_store %arg8[%c0_11, %c0_12], %12 {strides = array<i32>} : memref<128x128xf32, #tpu.memory_space<vmem>>, vector<128x128xf32>,
    } else {
    }
    %c0 = arith.constant 0 : index
    %c0_1 = arith.constant 0 : index
    %3 = vector.load %arg8[%c0, %c0_1] : memref<128x128xf32, #tpu.memory_space<vmem>>, vector<128x128xf32>
    %c0_2 = arith.constant 0 : index
    %c0_3 = arith.constant 0 : index
    %4 = vector.load %arg3[%c0_2, %c0_3] : memref<128x128xbf16, #tpu.memory_space<vmem>>, vector<128x128xbf16>
    %c0_4 = arith.constant 0 : index
    %c0_5 = arith.constant 0 : index
    %5 = vector.load %arg4[%c0_4, %c0_5] : memref<128x128xbf16, #tpu.memory_space<vmem>>, vector<128x128xbf16>
    %cst = arith.constant dense<0.000000e+00> : vector<128x128xf32>
    %6 = tpu.matmul %4, %5, %cst {dimension_numbers = #tpu.dot_dimension_numbers<[1], [0], [0], [1], [0, 0, 1, 1], [], []>} : vector<128x128xbf16>, vector<128x128xbf16>, vector<128x128xf32> -> vector<128x128xf32>
    %7 = arith.addf %3, %6 : vector<128x128xf32>
    %c0_6 = arith.constant 0 : index
    %c0_7 = arith.constant 0 : index
    %8 = vector.load %arg8[%c0_6, %c0_7] : memref<128x128xf32, #tpu.memory_space<vmem>>, vector<128x128xf32>
    tpu.vector_store %arg8[%c0_6, %c0_7], %7 {strides = array<i32>} : memref<128x128xf32, #tpu.memory_space<vmem>>, vector<128x128xf32>,
    %c0_i32_8 = arith.constant 0 : i32
    %9 = arith.cmpi eq, %arg2, %c0_i32_8 : i32
    %10 = arith.extui %9 : i1 to i32
    %c0_i32_9 = arith.constant 0 : i32
    %11 = arith.cmpi ne, %10, %c0_i32_9 : i32
    scf.if %11 {
      %c0_10 = arith.constant 0 : index
      %c0_11 = arith.constant 0 : index
      %12 = vector.load %arg8[%c0_10, %c0_11] : memref<128x128xf32, #tpu.memory_space<vmem>>, vector<128x128xf32>
      %c0_12 = arith.constant 0 : index
      %c0_13 = arith.constant 0 : index
      %13 = vector.load %arg5[%c0_12, %c0_13] : memref<1x128xf32, #tpu.memory_space<vmem>>, vector<1x128xf32>
      %14 = vector.broadcast %13 : vector<1x128xf32> to vector<128x128xf32>
      %15 = arith.addf %12, %14 : vector<128x128xf32>
      %c0_14 = arith.constant 0 : index
      %c0_15 = arith.constant 0 : index
      %16 = vector.load %arg6[%c0_14, %c0_15] : memref<128x128xbf16, #tpu.memory_space<vmem>>, vector<128x128xbf16>
      %17 = arith.extf %16 : vector<128x128xbf16> to vector<128x128xf32>
      %18 = arith.addf %15, %17 : vector<128x128xf32>
      %cst_16 = arith.constant 0.000000e+00 : f32
      %19 = vector.broadcast %cst_16 : f32 to vector<128x128xf32>
      %20 = arith.maximumf %18, %19 : vector<128x128xf32>
      %21 = arith.truncf %20 : vector<128x128xf32> to vector<128x128xbf16>
      %c0_17 = arith.constant 0 : index
      %c0_18 = arith.constant 0 : index
      %22 = vector.load %arg7[%c0_17, %c0_18] : memref<128x128xbf16, #tpu.memory_space<vmem>>, vector<128x128xbf16>
      tpu.vector_store %arg7[%c0_17, %c0_18], %21 {strides = array<i32>} : memref<128x128xbf16, #tpu.memory_space<vmem>>, vector<128x128xbf16>,
    } else {
    }
    return
  }
  func.func @transform_0(%arg0: i32, %arg1: i32, %arg2: i32) -> (i32, i32) {
    %c0_i32 = arith.constant 0 : i32
    return %arg0, %arg2 : i32, i32
  }
  func.func @transform_1(%arg0: i32, %arg1: i32, %arg2: i32) -> (i32, i32) {
    %c0_i32 = arith.constant 0 : i32
    return %arg2, %arg1 : i32, i32
  }
  func.func @transform_2(%arg0: i32, %arg1: i32, %arg2: i32) -> (i32, i32) {
    %c0_i32 = arith.constant 0 : i32
    %c0_i32_0 = arith.constant 0 : i32
    return %c0_i32, %arg1 : i32, i32
  }
  func.func @transform_3(%arg0: i32, %arg1: i32, %arg2: i32) -> (i32, i32) {
    %c0_i32 = arith.constant 0 : i32
    return %arg0, %arg1 : i32, i32
  }
  func.func @transform_4(%arg0: i32, %arg1: i32, %arg2: i32) -> (i32, i32) {
    %c0_i32 = arith.constant 0 : i32
    return %arg0, %arg1 : i32, i32
  }
}

</mosaic_0001>

<bundles_post_ra>
// kernel: resnet_layer_forward.4
= control target key start
LH: loop header
LB: loop body
LE: loop exit
PB: predicated region body
PF: predicated region fallthrough
CT: control target
= control target key end

     0   :  { %s597_s1 = inlined_call_operand.vmem [shape: bf16[128,128], index: 1, kind: input, shape index: {}]   ;;  %s598_s2 = inlined_call_operand.vmem [shape: f32[1,128], index: 2, kind: input, shape index: {}]   ;;  %s599_s0 = inlined_call_operand.vmem [shape: bf16[128,128], index: 0, kind: input, shape index: {}]   ;;  %s600_s3 = inlined_call_operand.vmem [shape: bf16[128,128], index: 3, kind: output, shape index: {}]  }
   0x1   :  { %v429_v0 = vld [vmem:[%s597_s1 + $0x38] sm:$0xff]  ;;  %v428_v1 = vld [vmem:[%s597_s1 + $0x30] sm:$0xff]  ;;  %v427_v2 = vld [vmem:[%s597_s1 + $0x28] sm:$0xff] }
   0x2   :  { %178 = vmatpush.bf16.msra.mxu0 %v429_v0  ;;  %477 = vmatpush.bf16.msra.mxu1 %v429_v0  ;;  %v426_v3 = vld [vmem:[%s597_s1 + $0x20] sm:$0xff]  ;;  %v425_v4 = vld [vmem:[%s597_s1 + $0x18] sm:$0xff]  ;;  %v424_v5 = vld [vmem:[%s597_s1 + $0x10] sm:$0xff] }
   0x3   :  { %478 = vmatpush.bf16.msra.mxu2 %v429_v0  ;;  %479 = vmatpush.bf16.msra.mxu3 %v429_v0  ;;  %v423_v6 = vld [vmem:[%s597_s1 + $0x8] sm:$0xff]  ;;  %v422_v7 = vld [vmem:[%s597_s1] sm:$0xff]  ;;  %v416_v9 = vld [vmem:[%s599_s0 + $0x10] sm:$0xff] }
   0x4   :  { %v414_v8 = vld [vmem:[%s599_s0] sm:$0xff]  ;;  %v420_v11 = vld [vmem:[%s599_s0 + $0x30] sm:$0xff]  ;;  %v415_v12 = vld [vmem:[%s599_s0 + $0x8] sm:$0xff] }
   0x5   :  { %v418_v10 = vld [vmem:[%s599_s0 + $0x20] sm:$0xff]  ;;  %v417_v13 = vld [vmem:[%s599_s0 + $0x18] sm:$0xff]  ;;  %v419_v14 = vld [vmem:[%s599_s0 + $0x28] sm:$0xff] }
   0x6   :  { %179 = vmatpush.bf16.msra.mxu0 %v428_v1  ;;  %480 = vmatpush.bf16.msra.mxu1 %v428_v1  ;;  %v421_v15 = vld [vmem:[%s599_s0 + $0x38] sm:$0xff]  ;;  %v501_v18 = vld [vmem:[%s598_s2] ss:$0 sm:$0xff] }
   0x7   :  { %481 = vmatpush.bf16.msra.mxu2 %v428_v1  ;;  %482 = vmatpush.bf16.msra.mxu3 %v428_v1 }
   0xa   :  { %180 = vmatpush.bf16.msra.mxu0 %v427_v2  ;;  %483 = vmatpush.bf16.msra.mxu1 %v427_v2 }
   0xb   :  { %484 = vmatpush.bf16.msra.mxu2 %v427_v2  ;;  %485 = vmatpush.bf16.msra.mxu3 %v427_v2 }
   0xe   :  { %181 = vmatpush.bf16.msra.mxu0 %v426_v3  ;;  %486 = vmatpush.bf16.msra.mxu1 %v426_v3 }
   0xf   :  { %487 = vmatpush.bf16.msra.mxu2 %v426_v3  ;;  %488 = vmatpush.bf16.msra.mxu3 %v426_v3 }
  0x12   :  { %182 = vmatpush.bf16.msra.mxu0 %v425_v4  ;;  %489 = vmatpush.bf16.msra.mxu1 %v425_v4 }
  0x13   :  { %490 = vmatpush.bf16.msra.mxu2 %v425_v4  ;;  %491 = vmatpush.bf16.msra.mxu3 %v425_v4 }
  0x16   :  { %183 = vmatpush.bf16.msra.mxu0 %v424_v5  ;;  %492 = vmatpush.bf16.msra.mxu1 %v424_v5 }
  0x17   :  { %493 = vmatpush.bf16.msra.mxu2 %v424_v5  ;;  %494 = vmatpush.bf16.msra.mxu3 %v424_v5 }
  0x1a   :  { %184 = vmatpush.bf16.msra.mxu0 %v423_v6  ;;  %495 = vmatpush.bf16.msra.mxu1 %v423_v6 }
  0x1b   :  { %496 = vmatpush.bf16.msra.mxu2 %v423_v6  ;;  %497 = vmatpush.bf16.msra.mxu3 %v423_v6 }
  0x1e   :  { %185 = vmatpush.bf16.msra.mxu0 %v422_v7  ;;  %498 = vmatpush.bf16.msra.mxu1 %v422_v7 }
  0x1f   :  { %499 = vmatpush.bf16.msra.mxu2 %v422_v7  ;;  %500 = vmatpush.bf16.msra.mxu3 %v422_v7 }
  0x21   :  { %186 = vmatmul.bf16.vlgmr.msra.gmra.mxu0 %v414_v8  ;;  %196 = vmatmul.bf16.vlgmr.msra.gmra.mxu1 %v416_v9 }
  0x22   :  { %206 = vmatmul.bf16.vlgmr.msra.gmra.mxu2 %v418_v10  ;;  %216 = vmatmul.bf16.vlgmr.msra.gmra.mxu3 %v420_v11 }
  0x31   :  { %191 = vmatmul.bf16.gmra.mxu0 %v415_v12  ;;  %201 = vmatmul.bf16.gmra.mxu1 %v417_v13 }
  0x32   :  { %211 = vmatmul.bf16.gmra.mxu2 %v419_v14  ;;  %221 = vmatmul.bf16.gmra.mxu3 %v421_v15 }
  0x9e   :  { %v187_v16 = vpop.f32.mrf.mxu0  ;;  %v197_v17 = vpop.f32.mrf.mxu1 }
  0x9f   :  { %v282_v19 = vadd.f32 %v501_v18, %v187_v16  ;;  %v286_v20 = vadd.f32 %v501_v18, %v197_v17 }
  0xa1   :  { %v298_v27 = vmax.f32 %v282_v19, 0.0  ;;  %v302_v28 = vmax.f32 %v286_v20, 0.0 }
  0xa5   :  { %v207_v21 = vpop.f32.mrf.mxu2  ;;  %v217_v22 = vpop.f32.mrf.mxu3 }
  0xa6   :  { %v189_v23 = vpop.f32.mrf.mxu0  ;;  %v199_v24 = vpop.f32.mrf.mxu1  ;;  %v290_v33 = vadd.f32 %v501_v18, %v207_v21  ;;  %v294_v34 = vadd.f32 %v501_v18, %v217_v22 }
  0xa7   :  { %v283_v25 = vadd.f32 %v501_v18, %v189_v23  ;;  %v287_v26 = vadd.f32 %v501_v18, %v199_v24 }
  0xa8   :  { %v306_v41 = vmax.f32 %v290_v33, 0.0  ;;  %v310_v42 = vmax.f32 %v294_v34, 0.0 }
  0xa9   :  { %v299_v29 = vmax.f32 %v283_v25, 0.0  ;;  %v303_v30 = vmax.f32 %v287_v26, 0.0 }
  0xab   :  { %v433_v31 = vpack.c.bf16 %v299_v29, %v298_v27  ;;  %v443_v32 = vpack.c.bf16 %v303_v30, %v302_v28 }
  0xad   :  { %434 = vst [vmem:[%s600_s3] sm:$0xff] %v433_v31   ;;  %v209_v35 = vpop.f32.mrf.mxu2  ;;  %v219_v36 = vpop.f32.mrf.mxu3 }
  0xae   :  { %471 = vst [vmem:[%s600_s3 + $0x10] sm:$0xff] %v443_v32   ;;  %v291_v37 = vadd.f32 %v501_v18, %v209_v35  ;;  %v295_v38 = vadd.f32 %v501_v18, %v219_v36  ;;  %v192_v39 = vpop.f32.mrf.mxu0  ;;  %v202_v40 = vpop.f32.mrf.mxu1 }
  0xaf   :  { %v284_v47 = vadd.f32 %v501_v18, %v192_v39  ;;  %v288_v48 = vadd.f32 %v501_v18, %v202_v40 }
  0xb0   :  { %v307_v43 = vmax.f32 %v291_v37, 0.0  ;;  %v311_v44 = vmax.f32 %v295_v38, 0.0 }
  0xb1   :  { %v300_v55 = vmax.f32 %v284_v47, 0.0  ;;  %v304_v56 = vmax.f32 %v288_v48, 0.0 }
  0xb2   :  { %v453_v45 = vpack.c.bf16 %v307_v43, %v306_v41  ;;  %v463_v46 = vpack.c.bf16 %v311_v44, %v310_v42 }
  0xb4   :  { %473 = vst [vmem:[%s600_s3 + $0x20] sm:$0xff] %v453_v45  }
  0xb5   :  { %475 = vst [vmem:[%s600_s3 + $0x30] sm:$0xff] %v463_v46   ;;  %v212_v49 = vpop.f32.mrf.mxu2  ;;  %v222_v50 = vpop.f32.mrf.mxu3 }
  0xb6   :  { %v194_v51 = vpop.f32.mrf.mxu0  ;;  %v204_v52 = vpop.f32.mrf.mxu1  ;;  %v292_v61 = vadd.f32 %v501_v18, %v212_v49  ;;  %v296_v62 = vadd.f32 %v501_v18, %v222_v50 }
  0xb7   :  { %v285_v53 = vadd.f32 %v501_v18, %v194_v51  ;;  %v289_v54 = vadd.f32 %v501_v18, %v204_v52 }
  0xb8   :  { %v308_v3 = vmax.f32 %v292_v61, 0.0  ;;  %v312_v4 = vmax.f32 %v296_v62, 0.0 }
  0xb9   :  { %v301_v57 = vmax.f32 %v285_v53, 0.0  ;;  %v305_v58 = vmax.f32 %v289_v54, 0.0 }
  0xbb   :  { %v438_v59 = vpack.c.bf16 %v301_v57, %v300_v55  ;;  %v448_v60 = vpack.c.bf16 %v305_v58, %v304_v56 }
  0xbd   :  { %470 = vst [vmem:[%s600_s3 + $0x8] sm:$0xff] %v438_v59   ;;  %v214_v63 = vpop.f32.mrf.mxu2  ;;  %v224_v0 = vpop.f32.mrf.mxu3 }
  0xbe   :  { %472 = vst [vmem:[%s600_s3 + $0x18] sm:$0xff] %v448_v60   ;;  %v293_v1 = vadd.f32 %v501_v18, %v214_v63  ;;  %v297_v2 = vadd.f32 %v501_v18, %v224_v0 }
  0xc0   :  { %v309_v5 = vmax.f32 %v293_v1, 0.0  ;;  %v313_v6 = vmax.f32 %v297_v2, 0.0 }
  0xc2   :  { %v458_v7 = vpack.c.bf16 %v309_v5, %v308_v3  ;;  %v468_v8 = vpack.c.bf16 %v313_v6, %v312_v4 }
  0xc4   :  { %474 = vst [vmem:[%s600_s3 + $0x28] sm:$0xff] %v458_v7  }
  0xc5   :  { %476 = vst [vmem:[%s600_s3 + $0x38] sm:$0xff] %v468_v8  }

// kernel: resnet_layer_forward.5
= control target key start
LH: loop header
LB: loop body
LE: loop exit
PB: predicated region body
PF: predicated region fallthrough
CT: control target
= control target key end

     0   :  { %s994_s1 = inlined_call_operand.vmem [shape: bf16[128,128], index: 1, kind: input, shape index: {}]   ;;  %s995_s4 = inlined_call_operand.vmem [shape: bf16[128,128], index: 4, kind: input, shape index: {}]   ;;  %s996_s2 = inlined_call_operand.vmem [shape: f32[1,128], index: 2, kind: input, shape index: {}]   ;;  %s997_s0 = inlined_call_operand.vmem [shape: bf16[128,128], index: 0, kind: input, shape index: {}]   ;;  %s998_s3 = inlined_call_operand.vmem [shape: bf16[128,128], index: 3, kind: input, shape index: {}]   ;;  %s999_s5 = inlined_call_operand.vmem [shape: f32[1,128], index: 5, kind: input, shape index: {}]   ;;  %s1000_s6 = inlined_call_operand.vmem [shape: bf16[128,128], index: 6, kind: output, shape index: {}]  }
   0x1   :  { %v715_v0 = vld [vmem:[%s994_s1 + $0x38] sm:$0xff]  ;;  %v714_v2 = vld [vmem:[%s994_s1 + $0x30] sm:$0xff]  ;;  %v713_v4 = vld [vmem:[%s994_s1 + $0x28] sm:$0xff] }
   0x2   :  { %v731_v1 = vld [vmem:[%s995_s4 + $0x38] sm:$0xff]  ;;  %187 = vmatpush.bf16.msra.mxu0 %v715_v0  ;;  %779 = vmatpush.bf16.msra.mxu2 %v715_v0  ;;  %v730_v3 = vld [vmem:[%s995_s4 + $0x30] sm:$0xff]  ;;  %v729_v5 = vld [vmem:[%s995_s4 + $0x28] sm:$0xff] }
   0x3   :  { %435 = vmatpush.bf16.msra.mxu1 %v731_v1  ;;  %787 = vmatpush.bf16.msra.mxu3 %v731_v1  ;;  %v712_v6 = vld [vmem:[%s994_s1 + $0x20] sm:$0xff]  ;;  %v711_v8 = vld [vmem:[%s994_s1 + $0x18] sm:$0xff]  ;;  %v710_v10 = vld [vmem:[%s994_s1 + $0x10] sm:$0xff] }
   0x4   :  { %v728_v7 = vld [vmem:[%s995_s4 + $0x20] sm:$0xff]  ;;  %v727_v9 = vld [vmem:[%s995_s4 + $0x18] sm:$0xff]  ;;  %v726_v11 = vld [vmem:[%s995_s4 + $0x10] sm:$0xff] }
   0x5   :  { %v709_v12 = vld [vmem:[%s994_s1 + $0x8] sm:$0xff]  ;;  %v708_v14 = vld [vmem:[%s994_s1] sm:$0xff]  ;;  %v702_v24 = vld [vmem:[%s997_s0 + $0x10] sm:$0xff] }
   0x6   :  { %188 = vmatpush.bf16.msra.mxu0 %v714_v2  ;;  %780 = vmatpush.bf16.msra.mxu2 %v714_v2  ;;  %v725_v13 = vld [vmem:[%s995_s4 + $0x8] sm:$0xff]  ;;  %v724_v15 = vld [vmem:[%s995_s4] sm:$0xff]  ;;  %v706_v25 = vld [vmem:[%s997_s0 + $0x30] sm:$0xff] }
   0x7   :  { %436 = vmatpush.bf16.msra.mxu1 %v730_v3  ;;  %788 = vmatpush.bf16.msra.mxu3 %v730_v3  ;;  %v700_v16 = vld [vmem:[%s997_s0] sm:$0xff]  ;;  %v701_v20 = vld [vmem:[%s997_s0 + $0x8] sm:$0xff]  ;;  %v718_v26 = vld [vmem:[%s998_s3 + $0x10] sm:$0xff] }
   0x8   :  { %v704_v17 = vld [vmem:[%s997_s0 + $0x20] sm:$0xff]  ;;  %v705_v21 = vld [vmem:[%s997_s0 + $0x28] sm:$0xff]  ;;  %v722_v27 = vld [vmem:[%s998_s3 + $0x30] sm:$0xff] }
   0x9   :  { %v716_v18 = vld [vmem:[%s998_s3] sm:$0xff]  ;;  %v717_v22 = vld [vmem:[%s998_s3 + $0x8] sm:$0xff]  ;;  %v703_v28 = vld [vmem:[%s997_s0 + $0x18] sm:$0xff] }
   0xa   :  { %189 = vmatpush.bf16.msra.mxu0 %v713_v4  ;;  %781 = vmatpush.bf16.msra.mxu2 %v713_v4  ;;  %v720_v19 = vld [vmem:[%s998_s3 + $0x20] sm:$0xff]  ;;  %v721_v23 = vld [vmem:[%s998_s3 + $0x28] sm:$0xff]  ;;  %v707_v29 = vld [vmem:[%s997_s0 + $0x38] sm:$0xff] }
   0xb   :  { %437 = vmatpush.bf16.msra.mxu1 %v729_v5  ;;  %789 = vmatpush.bf16.msra.mxu3 %v729_v5  ;;  %v719_v30 = vld [vmem:[%s998_s3 + $0x18] sm:$0xff]  ;;  %v931_v32 = vld [vmem:[%s996_s2] ss:$0 sm:$0xff] }
   0xc   :  { %v723_v31 = vld [vmem:[%s998_s3 + $0x38] sm:$0xff]  ;;  %v937_v38 = vld [vmem:[%s999_s5] ss:$0 sm:$0xff] }
   0xe   :  { %190 = vmatpush.bf16.msra.mxu0 %v712_v6  ;;  %782 = vmatpush.bf16.msra.mxu2 %v712_v6 }
   0xf   :  { %438 = vmatpush.bf16.msra.mxu1 %v728_v7  ;;  %790 = vmatpush.bf16.msra.mxu3 %v728_v7 }
  0x12   :  { %191 = vmatpush.bf16.msra.mxu0 %v711_v8  ;;  %783 = vmatpush.bf16.msra.mxu2 %v711_v8 }
  0x13   :  { %439 = vmatpush.bf16.msra.mxu1 %v727_v9  ;;  %791 = vmatpush.bf16.msra.mxu3 %v727_v9 }
  0x16   :  { %192 = vmatpush.bf16.msra.mxu0 %v710_v10  ;;  %784 = vmatpush.bf16.msra.mxu2 %v710_v10 }
  0x17   :  { %440 = vmatpush.bf16.msra.mxu1 %v726_v11  ;;  %792 = vmatpush.bf16.msra.mxu3 %v726_v11 }
  0x1a   :  { %193 = vmatpush.bf16.msra.mxu0 %v709_v12  ;;  %785 = vmatpush.bf16.msra.mxu2 %v709_v12 }
  0x1b   :  { %441 = vmatpush.bf16.msra.mxu1 %v725_v13  ;;  %793 = vmatpush.bf16.msra.mxu3 %v725_v13 }
  0x1e   :  { %194 = vmatpush.bf16.msra.mxu0 %v708_v14  ;;  %786 = vmatpush.bf16.msra.mxu2 %v708_v14 }
  0x1f   :  { %442 = vmatpush.bf16.msra.mxu1 %v724_v15  ;;  %794 = vmatpush.bf16.msra.mxu3 %v724_v15 }
  0x21   :  { %195 = vmatmul.bf16.vlgmr.msra.gmra.mxu0 %v700_v16  ;;  %215 = vmatmul.bf16.vlgmr.msra.gmra.mxu2 %v704_v17 }
  0x22   :  { %443 = vmatmul.bf16.vlgmr.msra.gmra.mxu1 %v716_v18  ;;  %463 = vmatmul.bf16.vlgmr.msra.gmra.mxu3 %v720_v19 }
  0x31   :  { %200 = vmatmul.bf16.gmra.mxu0 %v701_v20  ;;  %220 = vmatmul.bf16.gmra.mxu2 %v705_v21 }
  0x32   :  { %448 = vmatmul.bf16.gmra.mxu1 %v717_v22  ;;  %468 = vmatmul.bf16.gmra.mxu3 %v721_v23 }
  0x41   :  { %205 = vmatmul.bf16.gmra.mxu0 %v702_v24  ;;  %225 = vmatmul.bf16.gmra.mxu2 %v706_v25 }
  0x42   :  { %453 = vmatmul.bf16.gmra.mxu1 %v718_v26  ;;  %473 = vmatmul.bf16.gmra.mxu3 %v722_v27 }
  0x51   :  { %210 = vmatmul.bf16.gmra.mxu0 %v703_v28  ;;  %230 = vmatmul.bf16.gmra.mxu2 %v707_v29 }
  0x52   :  { %458 = vmatmul.bf16.gmra.mxu1 %v719_v30  ;;  %478 = vmatmul.bf16.gmra.mxu3 %v723_v31 }
  0x9e   :  { %v196_v33 = vpop.f32.mrf.mxu0 }
  0x9f   :  { %v444_v34 = vpop.f32.mrf.mxu1  ;;  %v291_v35 = vadd.f32 %v931_v32, %v196_v33 }
  0xa1   :  { %v484_v37 = vadd.f32 %v444_v34, %v291_v35 }
  0xa3   :  { %v504_v44 = vadd.f32 %v937_v38, %v484_v37 }
  0xa4   :  { %v216_v36 = vpop.f32.mrf.mxu2 }
  0xa5   :  { %v464_v39 = vpop.f32.mrf.mxu3  ;;  %v299_v41 = vadd.f32 %v931_v32, %v216_v36  ;;  %v520_v49 = vmax.f32 %v504_v44, 0.0 }
  0xa6   :  { %v198_v40 = vpop.f32.mrf.mxu0 }
  0xa7   :  { %v292_v42 = vadd.f32 %v931_v32, %v198_v40  ;;  %v446_v43 = vpop.f32.mrf.mxu1  ;;  %v492_v46 = vadd.f32 %v464_v39, %v299_v41 }
  0xa9   :  { %v485_v45 = vadd.f32 %v446_v43, %v292_v42  ;;  %v512_v54 = vadd.f32 %v937_v38, %v492_v46 }
  0xab   :  { %v505_v47 = vadd.f32 %v937_v38, %v485_v45  ;;  %v528_v60 = vmax.f32 %v512_v54, 0.0 }
  0xac   :  { %v218_v48 = vpop.f32.mrf.mxu2 }
  0xad   :  { %v521_v50 = vmax.f32 %v505_v47, 0.0  ;;  %v300_v51 = vadd.f32 %v931_v32, %v218_v48  ;;  %v466_v52 = vpop.f32.mrf.mxu3 }
  0xae   :  { %v201_v53 = vpop.f32.mrf.mxu0 }
  0xaf   :  { %v735_v55 = vpack.c.bf16 %v521_v50, %v520_v49  ;;  %v493_v56 = vadd.f32 %v466_v52, %v300_v51  ;;  %v449_v57 = vpop.f32.mrf.mxu1  ;;  %v293_v59 = vadd.f32 %v931_v32, %v201_v53 }
  0xb1   :  { %736 = vst [vmem:[%s1000_s6] sm:$0xff] %v735_v55   ;;  %v513_v58 = vadd.f32 %v937_v38, %v493_v56  ;;  %v486_v0 = vadd.f32 %v449_v57, %v293_v59 }
  0xb3   :  { %v529_v61 = vmax.f32 %v513_v58, 0.0  ;;  %v506_v6 = vadd.f32 %v937_v38, %v486_v0 }
  0xb4   :  { %v221_v62 = vpop.f32.mrf.mxu2 }
  0xb5   :  { %v755_v63 = vpack.c.bf16 %v529_v61, %v528_v60  ;;  %v469_v1 = vpop.f32.mrf.mxu3  ;;  %v301_v3 = vadd.f32 %v931_v32, %v221_v62  ;;  %v522_v11 = vmax.f32 %v506_v6, 0.0 }
  0xb6   :  { %v203_v2 = vpop.f32.mrf.mxu0 }
  0xb7   :  { %775 = vst [vmem:[%s1000_s6 + $0x20] sm:$0xff] %v755_v63   ;;  %v294_v4 = vadd.f32 %v931_v32, %v203_v2  ;;  %v451_v5 = vpop.f32.mrf.mxu1  ;;  %v494_v8 = vadd.f32 %v469_v1, %v301_v3 }
  0xb9   :  { %v487_v7 = vadd.f32 %v451_v5, %v294_v4  ;;  %v514_v16 = vadd.f32 %v937_v38, %v494_v8 }
  0xbb   :  { %v507_v9 = vadd.f32 %v937_v38, %v487_v7  ;;  %v530_v22 = vmax.f32 %v514_v16, 0.0 }
  0xbc   :  { %v223_v10 = vpop.f32.mrf.mxu2 }
  0xbd   :  { %v523_v12 = vmax.f32 %v507_v9, 0.0  ;;  %v302_v13 = vadd.f32 %v931_v32, %v223_v10  ;;  %v471_v14 = vpop.f32.mrf.mxu3 }
  0xbe   :  { %v206_v15 = vpop.f32.mrf.mxu0 }
  0xbf   :  { %v740_v17 = vpack.c.bf16 %v523_v12, %v522_v11  ;;  %v495_v18 = vadd.f32 %v471_v14, %v302_v13  ;;  %v454_v19 = vpop.f32.mrf.mxu1  ;;  %v295_v21 = vadd.f32 %v931_v32, %v206_v15 }
  0xc1   :  { %772 = vst [vmem:[%s1000_s6 + $0x8] sm:$0xff] %v740_v17   ;;  %v515_v20 = vadd.f32 %v937_v38, %v495_v18  ;;  %v488_v26 = vadd.f32 %v454_v19, %v295_v21 }
  0xc3   :  { %v531_v23 = vmax.f32 %v515_v20, 0.0  ;;  %v508_v33 = vadd.f32 %v937_v38, %v488_v26 }
  0xc4   :  { %v226_v24 = vpop.f32.mrf.mxu2 }
  0xc5   :  { %v760_v25 = vpack.c.bf16 %v531_v23, %v530_v22  ;;  %v474_v27 = vpop.f32.mrf.mxu3  ;;  %v303_v29 = vadd.f32 %v931_v32, %v226_v24  ;;  %v524_v39 = vmax.f32 %v508_v33, 0.0 }
  0xc6   :  { %v208_v28 = vpop.f32.mrf.mxu0 }
  0xc7   :  { %776 = vst [vmem:[%s1000_s6 + $0x28] sm:$0xff] %v760_v25   ;;  %v296_v30 = vadd.f32 %v931_v32, %v208_v28  ;;  %v456_v31 = vpop.f32.mrf.mxu1  ;;  %v496_v35 = vadd.f32 %v474_v27, %v303_v29 }
  0xc9   :  { %v489_v34 = vadd.f32 %v456_v31, %v296_v30  ;;  %v516_v44 = vadd.f32 %v937_v38, %v496_v35 }
  0xcb   :  { %v509_v36 = vadd.f32 %v937_v38, %v489_v34  ;;  %v532_v50 = vmax.f32 %v516_v44, 0.0 }
  0xcc   :  { %v228_v37 = vpop.f32.mrf.mxu2 }
  0xcd   :  { %v525_v40 = vmax.f32 %v509_v36, 0.0  ;;  %v304_v41 = vadd.f32 %v931_v32, %v228_v37  ;;  %v476_v42 = vpop.f32.mrf.mxu3 }
  0xce   :  { %v211_v43 = vpop.f32.mrf.mxu0 }
  0xcf   :  { %v745_v45 = vpack.c.bf16 %v525_v40, %v524_v39  ;;  %v497_v46 = vadd.f32 %v476_v42, %v304_v41  ;;  %v459_v47 = vpop.f32.mrf.mxu1  ;;  %v297_v49 = vadd.f32 %v931_v32, %v211_v43 }
  0xd1   :  { %773 = vst [vmem:[%s1000_s6 + $0x10] sm:$0xff] %v745_v45   ;;  %v517_v48 = vadd.f32 %v937_v38, %v497_v46  ;;  %v490_v54 = vadd.f32 %v459_v47, %v297_v49 }
  0xd3   :  { %v533_v51 = vmax.f32 %v517_v48, 0.0  ;;  %v510_v60 = vadd.f32 %v937_v38, %v490_v54 }
  0xd4   :  { %v231_v52 = vpop.f32.mrf.mxu2 }
  0xd5   :  { %v765_v53 = vpack.c.bf16 %v533_v51, %v532_v50  ;;  %v479_v55 = vpop.f32.mrf.mxu3  ;;  %v305_v57 = vadd.f32 %v931_v32, %v231_v52  ;;  %v526_v1 = vmax.f32 %v510_v60, 0.0 }
  0xd6   :  { %v213_v56 = vpop.f32.mrf.mxu0 }
  0xd7   :  { %777 = vst [vmem:[%s1000_s6 + $0x30] sm:$0xff] %v765_v53   ;;  %v298_v58 = vadd.f32 %v931_v32, %v213_v56  ;;  %v461_v59 = vpop.f32.mrf.mxu1  ;;  %v498_v62 = vadd.f32 %v479_v55, %v305_v57 }
  0xd9   :  { %v491_v61 = vadd.f32 %v461_v59, %v298_v58  ;;  %v518_v5 = vadd.f32 %v937_v38, %v498_v62 }
  0xdb   :  { %v511_v63 = vadd.f32 %v937_v38, %v491_v61  ;;  %v534_v9 = vmax.f32 %v518_v5, 0.0 }
  0xdc   :  { %v233_v0 = vpop.f32.mrf.mxu2 }
  0xdd   :  { %v527_v2 = vmax.f32 %v511_v63, 0.0  ;;  %v306_v3 = vadd.f32 %v931_v32, %v233_v0  ;;  %v481_v4 = vpop.f32.mrf.mxu3 }
  0xdf   :  { %v750_v6 = vpack.c.bf16 %v527_v2, %v526_v1  ;;  %v499_v7 = vadd.f32 %v481_v4, %v306_v3 }
  0xe1   :  { %774 = vst [vmem:[%s1000_s6 + $0x18] sm:$0xff] %v750_v6   ;;  %v519_v8 = vadd.f32 %v937_v38, %v499_v7 }
  0xe3   :  { %v535_v10 = vmax.f32 %v519_v8, 0.0 }
  0xe5   :  { %v770_v11 = vpack.c.bf16 %v535_v10, %v534_v9 }
  0xe7   :  { %778 = vst [vmem:[%s1000_s6 + $0x38] sm:$0xff] %v770_v11  }

// kernel: resnet_layer_forward.7
= control target key start
LH: loop header
LB: loop body
LE: loop exit
PB: predicated region body
PF: predicated region fallthrough
CT: control target
= control target key end

     0   :  { %s734_s1 = inlined_call_operand.vmem [shape: bf16[128,128], index: 1, kind: input, shape index: {}]   ;;  %s735_s2 = inlined_call_operand.vmem [shape: f32[1,128], index: 2, kind: input, shape index: {}]   ;;  %s736_s0 = inlined_call_operand.vmem [shape: bf16[128,128], index: 0, kind: input, shape index: {}]   ;;  %s737_s3 = inlined_call_operand.vmem [shape: bf16[128,128], index: 3, kind: input, shape index: {}]   ;;  %s738_s4 = inlined_call_operand.vmem [shape: bf16[128,128], index: 4, kind: output, shape index: {}]  }
   0x1   :  { %v480_v0 = vld [vmem:[%s734_s1 + $0x38] sm:$0xff]  ;;  %v479_v1 = vld [vmem:[%s734_s1 + $0x30] sm:$0xff]  ;;  %v478_v2 = vld [vmem:[%s734_s1 + $0x28] sm:$0xff] }
   0x2   :  { %181 = vmatpush.bf16.msra.mxu0 %v480_v0  ;;  %567 = vmatpush.bf16.msra.mxu1 %v480_v0  ;;  %v477_v3 = vld [vmem:[%s734_s1 + $0x20] sm:$0xff]  ;;  %v476_v4 = vld [vmem:[%s734_s1 + $0x18] sm:$0xff]  ;;  %v475_v5 = vld [vmem:[%s734_s1 + $0x10] sm:$0xff] }
   0x3   :  { %568 = vmatpush.bf16.msra.mxu2 %v480_v0  ;;  %569 = vmatpush.bf16.msra.mxu3 %v480_v0  ;;  %v474_v6 = vld [vmem:[%s734_s1 + $0x8] sm:$0xff]  ;;  %v473_v7 = vld [vmem:[%s734_s1] sm:$0xff]  ;;  %v467_v9 = vld [vmem:[%s736_s0 + $0x10] sm:$0xff] }
   0x4   :  { %v465_v8 = vld [vmem:[%s736_s0] sm:$0xff]  ;;  %v471_v11 = vld [vmem:[%s736_s0 + $0x30] sm:$0xff]  ;;  %v466_v12 = vld [vmem:[%s736_s0 + $0x8] sm:$0xff] }
   0x5   :  { %v469_v10 = vld [vmem:[%s736_s0 + $0x20] sm:$0xff]  ;;  %v468_v13 = vld [vmem:[%s736_s0 + $0x18] sm:$0xff]  ;;  %v470_v14 = vld [vmem:[%s736_s0 + $0x28] sm:$0xff] }
   0x6   :  { %182 = vmatpush.bf16.msra.mxu0 %v479_v1  ;;  %570 = vmatpush.bf16.msra.mxu1 %v479_v1  ;;  %v472_v15 = vld [vmem:[%s736_s0 + $0x38] sm:$0xff]  ;;  %v668_v18 = vld [vmem:[%s735_s2] ss:$0 sm:$0xff]  ;;  %v554_v20 = vld [vmem:[%s737_s3 + $0x10] sm:$0xff]  }
   0x7   :  { %571 = vmatpush.bf16.msra.mxu2 %v479_v1  ;;  %572 = vmatpush.bf16.msra.mxu3 %v479_v1  ;;  %v482_v19 = vld [vmem:[%s737_s3] sm:$0xff]   ;;  %v491_v24 = vunpack.c.l.bf16 %v554_v20  ;;  %v492_v28 = vunpack.c.h.bf16 %v554_v20  ;;  %v558_v34 = vld [vmem:[%s737_s3 + $0x30] sm:$0xff]   ;;  %v553_v61 = vld [vmem:[%s737_s3 + $0x8] sm:$0xff]  }
   0x8   :  { %v483_v22 = vunpack.c.l.bf16 %v482_v19  ;;  %v484_v27 = vunpack.c.h.bf16 %v482_v19  ;;  %v556_v33 = vld [vmem:[%s737_s3 + $0x20] sm:$0xff]   ;;  %v507_v42 = vunpack.c.l.bf16 %v558_v34  ;;  %v508_v48 = vunpack.c.h.bf16 %v558_v34  ;;  %v555_v62 = vld [vmem:[%s737_s3 + $0x18] sm:$0xff]  }
   0x9   :  { %v499_v40 = vunpack.c.l.bf16 %v556_v33  ;;  %v500_v47 = vunpack.c.h.bf16 %v556_v33  ;;  %v559_v19 = vld [vmem:[%s737_s3 + $0x38] sm:$0xff]  }
   0xa   :  { %183 = vmatpush.bf16.msra.mxu0 %v478_v2  ;;  %573 = vmatpush.bf16.msra.mxu1 %v478_v2  ;;  %v512_v33 = vunpack.c.h.bf16 %v559_v19 }
   0xb   :  { %574 = vmatpush.bf16.msra.mxu2 %v478_v2  ;;  %575 = vmatpush.bf16.msra.mxu3 %v478_v2 }
   0xe   :  { %184 = vmatpush.bf16.msra.mxu0 %v477_v3  ;;  %576 = vmatpush.bf16.msra.mxu1 %v477_v3 }
   0xf   :  { %577 = vmatpush.bf16.msra.mxu2 %v477_v3  ;;  %578 = vmatpush.bf16.msra.mxu3 %v477_v3 }
  0x12   :  { %185 = vmatpush.bf16.msra.mxu0 %v476_v4  ;;  %579 = vmatpush.bf16.msra.mxu1 %v476_v4 }
  0x13   :  { %580 = vmatpush.bf16.msra.mxu2 %v476_v4  ;;  %581 = vmatpush.bf16.msra.mxu3 %v476_v4  ;;  %v487_v4 = vunpack.c.l.bf16 %v553_v61 }
  0x16   :  { %186 = vmatpush.bf16.msra.mxu0 %v475_v5  ;;  %582 = vmatpush.bf16.msra.mxu1 %v475_v5 }
  0x17   :  { %583 = vmatpush.bf16.msra.mxu2 %v475_v5  ;;  %584 = vmatpush.bf16.msra.mxu3 %v475_v5 }
  0x1a   :  { %187 = vmatpush.bf16.msra.mxu0 %v474_v6  ;;  %585 = vmatpush.bf16.msra.mxu1 %v474_v6 }
  0x1b   :  { %586 = vmatpush.bf16.msra.mxu2 %v474_v6  ;;  %587 = vmatpush.bf16.msra.mxu3 %v474_v6  ;;  %v495_v6 = vunpack.c.l.bf16 %v555_v62 }
  0x1e   :  { %188 = vmatpush.bf16.msra.mxu0 %v473_v7  ;;  %588 = vmatpush.bf16.msra.mxu1 %v473_v7 }
  0x1f   :  { %589 = vmatpush.bf16.msra.mxu2 %v473_v7  ;;  %590 = vmatpush.bf16.msra.mxu3 %v473_v7 }
  0x21   :  { %189 = vmatmul.bf16.vlgmr.msra.gmra.mxu0 %v465_v8  ;;  %199 = vmatmul.bf16.vlgmr.msra.gmra.mxu1 %v467_v9 }
  0x22   :  { %209 = vmatmul.bf16.vlgmr.msra.gmra.mxu2 %v469_v10  ;;  %219 = vmatmul.bf16.vlgmr.msra.gmra.mxu3 %v471_v11  ;;  %v488_v11 = vunpack.c.h.bf16 %v553_v61 }
  0x31   :  { %194 = vmatmul.bf16.gmra.mxu0 %v466_v12  ;;  %204 = vmatmul.bf16.gmra.mxu1 %v468_v13  ;;  %v496_v12 = vunpack.c.h.bf16 %v555_v62 }
  0x32   :  { %214 = vmatmul.bf16.gmra.mxu2 %v470_v14  ;;  %224 = vmatmul.bf16.gmra.mxu3 %v472_v15 }
  0x9e   :  { %v190_v16 = vpop.f32.mrf.mxu0  ;;  %v200_v17 = vpop.f32.mrf.mxu1 }
  0x9f   :  { %v285_v21 = vadd.f32 %v668_v18, %v190_v16  ;;  %v289_v23 = vadd.f32 %v668_v18, %v200_v17  ;;  %v557_v17 = vld [vmem:[%s737_s3 + $0x28] sm:$0xff]  }
  0xa1   :  { %v333_v31 = vadd.f32 %v483_v22, %v285_v21  ;;  %v337_v32 = vadd.f32 %v491_v24, %v289_v23 }
  0xa3   :  { %v349_v43 = vmax.f32 %v333_v31, 0.0  ;;  %v353_v44 = vmax.f32 %v337_v32, 0.0  ;;  %v504_v32 = vunpack.c.h.bf16 %v557_v17 }
  0xa5   :  { %v210_v25 = vpop.f32.mrf.mxu2  ;;  %v220_v26 = vpop.f32.mrf.mxu3 }
  0xa6   :  { %v192_v29 = vpop.f32.mrf.mxu0  ;;  %v202_v30 = vpop.f32.mrf.mxu1  ;;  %v293_v39 = vadd.f32 %v668_v18, %v210_v25  ;;  %v297_v41 = vadd.f32 %v668_v18, %v220_v26  ;;  %v503_v25 = vunpack.c.l.bf16 %v557_v17 }
  0xa7   :  { %v286_v35 = vadd.f32 %v668_v18, %v192_v29  ;;  %v290_v36 = vadd.f32 %v668_v18, %v202_v30 }
  0xa8   :  { %v341_v53 = vadd.f32 %v499_v40, %v293_v39  ;;  %v345_v54 = vadd.f32 %v507_v42, %v297_v41 }
  0xa9   :  { %v334_v37 = vadd.f32 %v484_v27, %v286_v35  ;;  %v338_v38 = vadd.f32 %v492_v28, %v290_v36  ;;  %v511_v27 = vunpack.c.l.bf16 %v559_v19 }
  0xaa   :  { %v357_v63 = vmax.f32 %v341_v53, 0.0  ;;  %v361_v0 = vmax.f32 %v345_v54, 0.0 }
  0xab   :  { %v350_v45 = vmax.f32 %v334_v37, 0.0  ;;  %v354_v46 = vmax.f32 %v338_v38, 0.0 }
  0xad   :  { %v516_v49 = vpack.c.bf16 %v350_v45, %v349_v43  ;;  %v526_v50 = vpack.c.bf16 %v354_v46, %v353_v44  ;;  %v212_v51 = vpop.f32.mrf.mxu2  ;;  %v222_v52 = vpop.f32.mrf.mxu3 }
  0xae   :  { %v294_v55 = vadd.f32 %v668_v18, %v212_v51  ;;  %v298_v56 = vadd.f32 %v668_v18, %v222_v52  ;;  %v195_v57 = vpop.f32.mrf.mxu0  ;;  %v205_v58 = vpop.f32.mrf.mxu1 }
  0xaf   :  { %517 = vst [vmem:[%s738_s4] sm:$0xff] %v516_v49   ;;  %v287_v3 = vadd.f32 %v668_v18, %v195_v57  ;;  %v291_v5 = vadd.f32 %v668_v18, %v205_v58 }
  0xb0   :  { %561 = vst [vmem:[%s738_s4 + $0x10] sm:$0xff] %v526_v50   ;;  %v342_v59 = vadd.f32 %v500_v47, %v294_v55  ;;  %v346_v60 = vadd.f32 %v508_v48, %v298_v56 }
  0xb1   :  { %v335_v15 = vadd.f32 %v487_v4, %v287_v3  ;;  %v339_v16 = vadd.f32 %v495_v6, %v291_v5 }
  0xb2   :  { %v358_v1 = vmax.f32 %v342_v59, 0.0  ;;  %v362_v2 = vmax.f32 %v346_v60, 0.0 }
  0xb3   :  { %v351_v28 = vmax.f32 %v335_v15, 0.0  ;;  %v355_v29 = vmax.f32 %v339_v16, 0.0 }
  0xb4   :  { %v536_v7 = vpack.c.bf16 %v358_v1, %v357_v63  ;;  %v546_v8 = vpack.c.bf16 %v362_v2, %v361_v0 }
  0xb5   :  { %v215_v9 = vpop.f32.mrf.mxu2  ;;  %v225_v10 = vpop.f32.mrf.mxu3 }
  0xb6   :  { %563 = vst [vmem:[%s738_s4 + $0x20] sm:$0xff] %v536_v7   ;;  %v197_v13 = vpop.f32.mrf.mxu0  ;;  %v207_v14 = vpop.f32.mrf.mxu1  ;;  %v295_v24 = vadd.f32 %v668_v18, %v215_v9  ;;  %v299_v26 = vadd.f32 %v668_v18, %v225_v10 }
  0xb7   :  { %565 = vst [vmem:[%s738_s4 + $0x30] sm:$0xff] %v546_v8   ;;  %v288_v20 = vadd.f32 %v668_v18, %v197_v13  ;;  %v292_v21 = vadd.f32 %v668_v18, %v207_v14 }
  0xb8   :  { %v343_v38 = vadd.f32 %v503_v25, %v295_v24  ;;  %v347_v39 = vadd.f32 %v511_v27, %v299_v26 }
  0xb9   :  { %v336_v22 = vadd.f32 %v488_v11, %v288_v20  ;;  %v340_v23 = vadd.f32 %v496_v12, %v292_v21 }
  0xba   :  { %v359_v44 = vmax.f32 %v343_v38, 0.0  ;;  %v363_v45 = vmax.f32 %v347_v39, 0.0 }
  0xbb   :  { %v352_v30 = vmax.f32 %v336_v22, 0.0  ;;  %v356_v31 = vmax.f32 %v340_v23, 0.0 }
  0xbd   :  { %v521_v34 = vpack.c.bf16 %v352_v30, %v351_v28  ;;  %v531_v35 = vpack.c.bf16 %v356_v31, %v355_v29  ;;  %v217_v36 = vpop.f32.mrf.mxu2  ;;  %v227_v37 = vpop.f32.mrf.mxu3 }
  0xbe   :  { %v296_v40 = vadd.f32 %v668_v18, %v217_v36  ;;  %v300_v41 = vadd.f32 %v668_v18, %v227_v37 }
  0xbf   :  { %560 = vst [vmem:[%s738_s4 + $0x8] sm:$0xff] %v521_v34  }
  0xc0   :  { %562 = vst [vmem:[%s738_s4 + $0x18] sm:$0xff] %v531_v35   ;;  %v344_v42 = vadd.f32 %v504_v32, %v296_v40  ;;  %v348_v43 = vadd.f32 %v512_v33, %v300_v41 }
  0xc2   :  { %v360_v46 = vmax.f32 %v344_v42, 0.0  ;;  %v364_v47 = vmax.f32 %v348_v43, 0.0 }
  0xc4   :  { %v541_v48 = vpack.c.bf16 %v360_v46, %v359_v44  ;;  %v551_v49 = vpack.c.bf16 %v364_v47, %v363_v45 }
  0xc6   :  { %564 = vst [vmem:[%s738_s4 + $0x28] sm:$0xff] %v541_v48  }
  0xc7   :  { %566 = vst [vmem:[%s738_s4 + $0x38] sm:$0xff] %v551_v49  }

</bundles_post_ra>
